<compile_context>
chip_gen: v7x
topology: tpu7x:2x2x1
jax: 0.10.0
libtpu: 0.0.40
codegen_flags: <defaults>
</compile_context>

<pallas_src>
import functools

import jax
import jax.numpy as jnp
from jax.experimental import pallas as pl
from jax.experimental.pallas import tpu as pltpu


def _triplet_kernel(x_ref, loss_ref, s1_acc, s2_acc, *, margin, total_rows,
                    tile_rows, inv_count):
    i = pl.program_id(0)

    @pl.when(i == 0)
    def _():
        s1_acc[...] = jnp.zeros_like(s1_acc)
        s2_acc[...] = jnp.zeros_like(s2_acc)

    # (TB, D) slabs; accumulate in f32 regardless of the input dtype.
    p = x_ref[0].astype(jnp.float32)
    p1 = x_ref[1].astype(jnp.float32)
    n1 = x_ref[2].astype(jnp.float32)

    def _normalize(v):
        # torch.norm(v, 2, -1, keepdim=True) + 1e-12 : eps is added to the
        # norm (NOT folded under the sqrt), matching the reference.
        nrm = jnp.sqrt(jnp.sum(v * v, axis=-1, keepdims=True))
        return v * pl.reciprocal(nrm + 1e-12)  # exact reciprocal

    anchor = _normalize(p)
    positive = _normalize(p1)
    negative = _normalize(n1)

    # Mask rows of a padded last tile (their contents are undefined).
    row = jax.lax.broadcasted_iota(jnp.int32, (tile_rows, 1), 0) + i * tile_rows
    valid = row < total_rows

    d1 = jnp.sum((anchor - positive) ** 2, axis=-1, keepdims=True)  # (TB, 1)
    d2 = jnp.sum((anchor - negative) ** 2, axis=-1, keepdims=True)  # (TB, 1)
    s1_acc[...] += jnp.sum(jnp.where(valid, d1, 0.0), keepdims=True)
    s2_acc[...] += jnp.sum(jnp.where(valid, d2, 0.0), keepdims=True)

    @pl.when(i == pl.num_programs(0) - 1)
    def _():
        s1 = s1_acc[...] * inv_count   # nn.MSELoss 'mean' over B*D elements
        s2 = s2_acc[...] * inv_count
        # loss = (s1 * margin) * s2**(-1)
        loss_ref[...] = (s1 * margin) * pl.reciprocal(s2)


def _pick_tile_rows(B, D, itemsize):
    """Largest batch tile whose double-buffered (3, TB, D) block stays ~<=8 MiB.

    8 MiB leaves headroom (f32 upcast, scratch, output) inside every
    generation's scoped-VMEM default (16 MiB v5e, 32 MiB v6e/v7x).
    """
    budget = 8 * 1024 * 1024
    per_row = 2 * 3 * D * itemsize        # 2 pipeline buffers
    tb = budget // max(per_row, 1)
    if tb >= B:
        return B                           # single full block
    return max(8, (int(tb) // 8) * 8)      # multiple of 8 (sublane tiling)


def triplet_my_loss(inputs, margin=1.0, tile_rows=None):
    """inputs: stacked (3, B, D) array (anchor, positive, negative) -> scalar."""
    assert inputs.ndim == 3 and inputs.shape[0] == 3, (
        "expected stacked (anchor, positive, negative) of shape (3, B, D)")
    _, B, D = inputs.shape
    itemsize = jnp.dtype(inputs.dtype).itemsize

    tb = tile_rows if tile_rows is not None else _pick_tile_rows(B, D, itemsize)
    tb = min(int(tb), B)
    nb = pl.cdiv(B, tb)

    kernel = functools.partial(
        _triplet_kernel,
        margin=float(margin),
        total_rows=B,
        tile_rows=tb,
        inv_count=1.0 / float(B * D))

    cost = pl.CostEstimate(
        flops=12 * B * D,
        transcendentals=3 * B + 1,
        bytes_accessed=3 * B * D * itemsize + 4)

    loss = pl.pallas_call(
        kernel,
        out_shape=jax.ShapeDtypeStruct((1, 1), jnp.float32),
        grid_spec=pltpu.PrefetchScalarGridSpec(
            num_scalar_prefetch=0,
            grid=(nb,),
            in_specs=[pl.BlockSpec((3, tb, D), lambda i: (0, i, 0))],
            out_specs=pl.BlockSpec((1, 1), lambda i: (0, 0)),
            scratch_shapes=[pltpu.VMEM((1, 1), jnp.float32),
                            pltpu.VMEM((1, 1), jnp.float32)]),
        compiler_params=pltpu.CompilerParams(
            dimension_semantics=("arbitrary",)),
        cost_estimate=cost,
    )(inputs)
    return loss[0, 0]


def _reference(inputs, margin=1.0):
    def _normalize(x):
        nrm = jnp.linalg.norm(x, ord=2, axis=-1, keepdims=True)
        return x / (nrm + 1e-12)

    a = _normalize(inputs[0].astype(jnp.float32))
    pos = _normalize(inputs[1].astype(jnp.float32))
    neg = _normalize(inputs[2].astype(jnp.float32))
    s1 = jnp.mean((a - pos) ** 2)
    s2 = jnp.mean((a - neg) ** 2)
    return (s1 * margin) / s2


if __name__ == "__main__":
    key = jax.random.PRNGKey(0)
    k_small, k_big = jax.random.split(key)

    # Small shape matching the module's (batch_size, num_classes) semantics.
    B, D = 8, 32
    x_small = jax.random.normal(k_small, (3, B, D), dtype=jnp.float32)
    out_small = jax.block_until_ready(triplet_my_loss(x_small, margin=1.0))
    ref_small = _reference(x_small, margin=1.0)
    assert jnp.allclose(out_small, ref_small, rtol=1e-5, atol=1e-6), (out_small, ref_small)

    # Multi-tile streaming path with a padded last tile (exercises the
    # grid accumulation + row masking).
    B2, D2 = 200, 128
    x_big = jax.random.normal(k_big, (3, B2, D2), dtype=jnp.float32)
    out_big = jax.block_until_ready(triplet_my_loss(x_big, margin=1.0, tile_rows=64))
    ref_big = _reference(x_big, margin=1.0)
    assert jnp.allclose(out_big, ref_big, rtol=1e-5, atol=1e-6), (out_big, ref_big)

    print("KERNEL_OK")
</pallas_src>

<mosaic_0001>
module attributes {stable_mosaic.version = 11 : i64} {
  func.func @_triplet_kernel(%arg0: i32, %arg1: memref<3x8x32xf32, #tpu.memory_space<vmem>>, %arg2: memref<1x1xf32, #tpu.memory_space<vmem>>, %arg3: memref<1x1xf32, #tpu.memory_space<vmem>>, %arg4: memref<1x1xf32, #tpu.memory_space<vmem>>) attributes {dimension_semantics = [#tpu.dimension_semantics<arbitrary>], iteration_bounds = array<i64: 1>, scalar_prefetch = 0 : i64, scratch_operands = 2 : i64, tpu.core_type = #tpu.core_type<tc>, window_params = [{transform_indices = @transform_0, window_bounds = array<i64: 3, 8, 32>}, {pipeline_mode = #tpu.pipeline_mode<synchronous>, transform_indices = @transform_1, window_bounds = array<i64: 1, 1>}]} {
    %c0_i32 = arith.constant 0 : i32
    %0 = arith.cmpi eq, %arg0, %c0_i32 : i32
    %1 = arith.extui %0 : i1 to i32
    %c0_i32_0 = arith.constant 0 : i32
    %2 = arith.cmpi ne, %1, %c0_i32_0 : i32
    scf.if %2 {
      %cst_29 = arith.constant 0.000000e+00 : f32
      %73 = vector.broadcast %cst_29 : f32 to vector<1x1xf32>
      %c0_30 = arith.constant 0 : index
      %c0_31 = arith.constant 0 : index
      %74 = vector.load %arg3[%c0_30, %c0_31] : memref<1x1xf32, #tpu.memory_space<vmem>>, vector<1x1xf32>
      tpu.vector_store %arg3[%c0_30, %c0_31], %73 {strides = array<i32>} : memref<1x1xf32, #tpu.memory_space<vmem>>, vector<1x1xf32>,
      %cst_32 = arith.constant 0.000000e+00 : f32
      %75 = vector.broadcast %cst_32 : f32 to vector<1x1xf32>
      %c0_33 = arith.constant 0 : index
      %c0_34 = arith.constant 0 : index
      %76 = vector.load %arg4[%c0_33, %c0_34] : memref<1x1xf32, #tpu.memory_space<vmem>>, vector<1x1xf32>
      tpu.vector_store %arg4[%c0_33, %c0_34], %75 {strides = array<i32>} : memref<1x1xf32, #tpu.memory_space<vmem>>, vector<1x1xf32>,
    } else {
    }
    %c0 = arith.constant 0 : index
    %c0_1 = arith.constant 0 : index
    %c0_2 = arith.constant 0 : index
    %3 = vector.load %arg1[%c0, %c0_1, %c0_2] : memref<3x8x32xf32, #tpu.memory_space<vmem>>, vector<1x8x32xf32>
    %4 = vector.shape_cast %3 : vector<1x8x32xf32> to vector<8x32xf32>
    %c1 = arith.constant 1 : index
    %c0_3 = arith.constant 0 : index
    %c0_4 = arith.constant 0 : index
    %5 = vector.load %arg1[%c1, %c0_3, %c0_4] : memref<3x8x32xf32, #tpu.memory_space<vmem>>, vector<1x8x32xf32>
    %6 = vector.shape_cast %5 : vector<1x8x32xf32> to vector<8x32xf32>
    %c2 = arith.constant 2 : index
    %c0_5 = arith.constant 0 : index
    %c0_6 = arith.constant 0 : index
    %7 = vector.load %arg1[%c2, %c0_5, %c0_6] : memref<3x8x32xf32, #tpu.memory_space<vmem>>, vector<1x8x32xf32>
    %8 = vector.shape_cast %7 : vector<1x8x32xf32> to vector<8x32xf32>
    %9 = arith.mulf %4, %4 : vector<8x32xf32>
    %cst = arith.constant dense<0.000000e+00> : vector<8xf32>
    %10 = vector.multi_reduction <add>, %9, %cst [1] : vector<8x32xf32> to vector<8xf32>
    %11 = vector.shape_cast %10 : vector<8xf32> to vector<8x1xf32>
    %12 = math.sqrt %11 : vector<8x1xf32>
    %cst_7 = arith.constant 9.99999996E-13 : f32
    %13 = vector.broadcast %cst_7 : f32 to vector<8x1xf32>
    %14 = arith.addf %12, %13 : vector<8x1xf32>
    %15 = tpu.reciprocal %14 : vector<8x1xf32> -> vector<8x1xf32>
    %16 = vector.broadcast %15 : vector<8x1xf32> to vector<8x32xf32>
    %17 = arith.mulf %4, %16 : vector<8x32xf32>
    %18 = arith.mulf %6, %6 : vector<8x32xf32>
    %cst_8 = arith.constant dense<0.000000e+00> : vector<8xf32>
    %19 = vector.multi_reduction <add>, %18, %cst_8 [1] : vector<8x32xf32> to vector<8xf32>
    %20 = vector.shape_cast %19 : vector<8xf32> to vector<8x1xf32>
    %21 = math.sqrt %20 : vector<8x1xf32>
    %cst_9 = arith.constant 9.99999996E-13 : f32
    %22 = vector.broadcast %cst_9 : f32 to vector<8x1xf32>
    %23 = arith.addf %21, %22 : vector<8x1xf32>
    %24 = tpu.reciprocal %23 : vector<8x1xf32> -> vector<8x1xf32>
    %25 = vector.broadcast %24 : vector<8x1xf32> to vector<8x32xf32>
    %26 = arith.mulf %6, %25 : vector<8x32xf32>
    %27 = arith.mulf %8, %8 : vector<8x32xf32>
    %cst_10 = arith.constant dense<0.000000e+00> : vector<8xf32>
    %28 = vector.multi_reduction <add>, %27, %cst_10 [1] : vector<8x32xf32> to vector<8xf32>
    %29 = vector.shape_cast %28 : vector<8xf32> to vector<8x1xf32>
    %30 = math.sqrt %29 : vector<8x1xf32>
    %cst_11 = arith.constant 9.99999996E-13 : f32
    %31 = vector.broadcast %cst_11 : f32 to vector<8x1xf32>
    %32 = arith.addf %30, %31 : vector<8x1xf32>
    %33 = tpu.reciprocal %32 : vector<8x1xf32> -> vector<8x1xf32>
    %34 = vector.broadcast %33 : vector<8x1xf32> to vector<8x32xf32>
    %35 = arith.mulf %8, %34 : vector<8x32xf32>
    %36 = tpu.iota {dimensions = array<i32: 0>} : vector<8x1xi32>
    %c8_i32 = arith.constant 8 : i32
    %37 = arith.muli %arg0, %c8_i32 : i32
    %38 = vector.broadcast %37 : i32 to vector<8x1xi32>
    %39 = arith.addi %36, %38 : vector<8x1xi32>
    %c8_i32_12 = arith.constant 8 : i32
    %40 = vector.broadcast %c8_i32_12 : i32 to vector<8x1xi32>
    %41 = arith.cmpi slt, %39, %40 : vector<8x1xi32>
    %42 = arith.subf %17, %26 : vector<8x32xf32>
    %43 = arith.mulf %42, %42 : vector<8x32xf32>
    %cst_13 = arith.constant dense<0.000000e+00> : vector<8xf32>
    %44 = vector.multi_reduction <add>, %43, %cst_13 [1] : vector<8x32xf32> to vector<8xf32>
    %45 = vector.shape_cast %44 : vector<8xf32> to vector<8x1xf32>
    %46 = arith.subf %17, %35 : vector<8x32xf32>
    %47 = arith.mulf %46, %46 : vector<8x32xf32>
    %cst_14 = arith.constant dense<0.000000e+00> : vector<8xf32>
    %48 = vector.multi_reduction <add>, %47, %cst_14 [1] : vector<8x32xf32> to vector<8xf32>
    %49 = vector.shape_cast %48 : vector<8xf32> to vector<8x1xf32>
    %c0_15 = arith.constant 0 : index
    %c0_16 = arith.constant 0 : index
    %50 = vector.load %arg3[%c0_15, %c0_16] : memref<1x1xf32, #tpu.memory_space<vmem>>, vector<1x1xf32>
    %cst_17 = arith.constant 0.000000e+00 : f32
    %51 = vector.broadcast %cst_17 : f32 to vector<8x1xf32>
    %52 = arith.select %41, %45, %51 : vector<8x1xi1>, vector<8x1xf32>
    %53 = vector.shape_cast %52 : vector<8x1xf32> to vector<1x8x1xf32>
    %cst_18 = arith.constant dense<0.000000e+00> : vector<1xf32>
    %54 = vector.multi_reduction <add>, %53, %cst_18 [1, 2] : vector<1x8x1xf32> to vector<1xf32>
    %55 = vector.shape_cast %54 : vector<1xf32> to vector<1x1x1xf32>
    %56 = vector.extract %55[0, 0, 0] : f32 from vector<1x1x1xf32>
    %57 = vector.broadcast %56 : f32 to vector<1x1xf32>
    %58 = arith.addf %50, %57 : vector<1x1xf32>
    %c0_19 = arith.constant 0 : index
    %c0_20 = arith.constant 0 : index
    %59 = vector.load %arg3[%c0_19, %c0_20] : memref<1x1xf32, #tpu.memory_space<vmem>>, vector<1x1xf32>
    tpu.vector_store %arg3[%c0_19, %c0_20], %58 {strides = array<i32>} : memref<1x1xf32, #tpu.memory_space<vmem>>, vector<1x1xf32>,
    %c0_21 = arith.constant 0 : index
    %c0_22 = arith.constant 0 : index
    %60 = vector.load %arg4[%c0_21, %c0_22] : memref<1x1xf32, #tpu.memory_space<vmem>>, vector<1x1xf32>
    %cst_23 = arith.constant 0.000000e+00 : f32
    %61 = vector.broadcast %cst_23 : f32 to vector<8x1xf32>
    %62 = arith.select %41, %49, %61 : vector<8x1xi1>, vector<8x1xf32>
    %63 = vector.shape_cast %62 : vector<8x1xf32> to vector<1x8x1xf32>
    %cst_24 = arith.constant dense<0.000000e+00> : vector<1xf32>
    %64 = vector.multi_reduction <add>, %63, %cst_24 [1, 2] : vector<1x8x1xf32> to vector<1xf32>
    %65 = vector.shape_cast %64 : vector<1xf32> to vector<1x1x1xf32>
    %66 = vector.extract %65[0, 0, 0] : f32 from vector<1x1x1xf32>
    %67 = vector.broadcast %66 : f32 to vector<1x1xf32>
    %68 = arith.addf %60, %67 : vector<1x1xf32>
    %c0_25 = arith.constant 0 : index
    %c0_26 = arith.constant 0 : index
    %69 = vector.load %arg4[%c0_25, %c0_26] : memref<1x1xf32, #tpu.memory_space<vmem>>, vector<1x1xf32>
    tpu.vector_store %arg4[%c0_25, %c0_26], %68 {strides = array<i32>} : memref<1x1xf32, #tpu.memory_space<vmem>>, vector<1x1xf32>,
    %c0_i32_27 = arith.constant 0 : i32
    %70 = arith.cmpi eq, %arg0, %c0_i32_27 : i32
    %71 = arith.extui %70 : i1 to i32
    %c0_i32_28 = arith.constant 0 : i32
    %72 = arith.cmpi ne, %71, %c0_i32_28 : i32
    scf.if %72 {
      %c0_29 = arith.constant 0 : index
      %c0_30 = arith.constant 0 : index
      %73 = vector.load %arg3[%c0_29, %c0_30] : memref<1x1xf32, #tpu.memory_space<vmem>>, vector<1x1xf32>
      %cst_31 = arith.constant 3.906250e-03 : f32
      %74 = vector.broadcast %cst_31 : f32 to vector<1x1xf32>
      %75 = arith.mulf %73, %74 : vector<1x1xf32>
      %c0_32 = arith.constant 0 : index
      %c0_33 = arith.constant 0 : index
      %76 = vector.load %arg4[%c0_32, %c0_33] : memref<1x1xf32, #tpu.memory_space<vmem>>, vector<1x1xf32>
      %cst_34 = arith.constant 3.906250e-03 : f32
      %77 = vector.broadcast %cst_34 : f32 to vector<1x1xf32>
      %78 = arith.mulf %76, %77 : vector<1x1xf32>
      %cst_35 = arith.constant 1.000000e+00 : f32
      %79 = vector.broadcast %cst_35 : f32 to vector<1x1xf32>
      %80 = arith.mulf %75, %79 : vector<1x1xf32>
      %81 = tpu.reciprocal %78 : vector<1x1xf32> -> vector<1x1xf32>
      %82 = arith.mulf %80, %81 : vector<1x1xf32>
      %c0_36 = arith.constant 0 : index
      %c0_37 = arith.constant 0 : index
      %83 = vector.load %arg2[%c0_36, %c0_37] : memref<1x1xf32, #tpu.memory_space<vmem>>, vector<1x1xf32>
      tpu.vector_store %arg2[%c0_36, %c0_37], %82 {strides = array<i32>} : memref<1x1xf32, #tpu.memory_space<vmem>>, vector<1x1xf32>,
    } else {
    }
    return
  }
  func.func @transform_0(%arg0: i32) -> (i32, i32, i32) {
    %c0_i32 = arith.constant 0 : i32
    %c0_i32_0 = arith.constant 0 : i32
    %c0_i32_1 = arith.constant 0 : i32
    return %c0_i32, %arg0, %c0_i32_0 : i32, i32, i32
  }
  func.func @transform_1(%arg0: i32) -> (i32, i32) {
    %c0_i32 = arith.constant 0 : i32
    %c0_i32_0 = arith.constant 0 : i32
    %c0_i32_1 = arith.constant 0 : i32
    return %c0_i32, %c0_i32_0 : i32, i32
  }
}

</mosaic_0001>

<bundles_post_ra>
// kernel: tpu_custom_call.1
= control target key start
LH: loop header
LB: loop body
LE: loop exit
PB: predicated region body
PF: predicated region fallthrough
CT: control target
= control target key end

     0   :  { %6 = vsyncpa [#allocation5], 0  ;;  %s271_s0 = inlined_call_operand.hbm [shape: f32[3,8,32], index: 0, kind: input, shape index: {}]   ;;  %s272_s1 = inlined_call_operand.hbm [shape: f32[1,1], index: 1, kind: output, shape index: {}]  }
   0x1   :  { %7 = vsyncpa [#allocation6], 0  ;;  %s222_s6 = smov [#allocation4]   ;;  %s174_s10 = scalar_lea.hbm %s271_s0, 384 }
   0x2   :  { %s13_s7 = sshll.u32 %s222_s6, 4  ;;  %p175_p0 = scmp.ne.s32.totalorder %s271_s0, %s174_s10  ;;  %s14_s7 = int_to_ptr.vmem [resolvable:$true] %s13_s7 }
   0x3   :  { %p178_p1 = scmp.lt.u32.totalorder %s174_s10, %s271_s0 }
   0x5   :  { %p180_p2 = pnand %p178_p1, %p175_p0 }
   0x7   :  { %183 = shalt.err (!%p180_p2)
}
   0x8   :  { %s184_s15 = scalar_lea.vmem %s14_s7, 384  ;;  %p189_p4 = scmp.lt.s32.totalorder %s14_s7, %s14_s7 }
   0x9   :  { %p185_p3 = scmp.ne.s32.totalorder %s14_s7, %s184_s15  ;;  %p190_p5 = scmp.lt.s32.totalorder %s184_s15, %s184_s15 }
   0xb   :  { %p191_p6 = por %p190_p5, %p189_p4 }
   0xd   :  { %p192_p7 = pnand %p191_p6, %p185_p3 }
   0xf   :  { %195 = shalt.err (!%p192_p7)
}
  0x10   :  { %s223_s16 = smov 128   ;;  %s224_s17 = smov 8  }
  0x11   :  { %19 = dma.hbm_to_vmem [thread:$0]  %s271_s0, 384, %s14_s7, [#allocation5], %s223_s16, %s223_s16, %s224_s17  }
  0x12   :  { %218 = dma.done.wait [#allocation5], 384  }
  0x13   :  { %219 = vsyncadd [#allocation5], 4294966912  ;;  %v34_v0 = vld [vmem:[#allocation4 + $0x10] sm:$0xff]  ;;  %vm36_vm0 = vcmask 261120   ;;  %v30_v1 = vld [vmem:[#allocation4] sm:$0xff]  ;;  %vm96_vm7 = vcmask 7168  }
  0x14   :  { %v32_v2 = vld [vmem:[#allocation4 + $0x8] sm:$0xff]  ;;  %v64_v3 = vmul.f32 %v34_v0, %v34_v0  ;;  %v35_v4 = vmul.f32 %v30_v1, %v30_v1  ;;  %vm27_vm8 = vcmask 0   ;;  %v225_v46 = vmov 0.0   ;;  %s226_s21 = smov [#allocation7]  }
  0x15   :  { %v50_v5 = vmul.f32 %v32_v2, %v32_v2  ;;  %28 = vst.msk [vmem:[#allocation2] sm:$0x1] %vm27_vm8, %v225_v46  ;;  %29 = vst.msk [vmem:[#allocation3] sm:$0x1] %vm27_vm8, %v225_v46  ;;  %s142_s22 = sshll.u32 %s226_s21, 4  ;;  %s143_s22 = int_to_ptr.vmem [resolvable:$true] %s142_s22 }
  0x16   :  { %v65_v6 = vsel %vm36_vm0, %v64_v3, 0.0  ;;  %v37_v7 = vsel %vm36_vm0, %v35_v4, 0.0  ;;  %s196_s23 = scalar_lea.vmem %s143_s22, 16  ;;  %s200_s24 = scalar_lea.vmem %s143_s22, 32 }
  0x17   :  { %66 = vadd.xlane.f32.xlu1 %v65_v6  ;;  %38 = vadd.xlane.f32.xlu0 %v37_v7  ;;  %v51_v8 = vsel %vm36_vm0, %v50_v5, 0.0  ;;  %p197_p8 = scmp.ne.s32.totalorder %s143_s22, %s196_s23  ;;  %p201_p9 = scmp.lt.s32.totalorder %s143_s22, %s143_s22 }
  0x18   :  { %p202_p10 = scmp.lt.s32.totalorder %s200_s24, %s196_s23 }
  0x1a   :  { %p203_p11 = por %p202_p10, %p201_p9 }
  0x1b   :  { %52 = vadd.xlane.f32.xlu0 %v51_v8 }
  0x1c   :  { %v94_v61 = vld [vmem:[#allocation2] sm:$0x1]  ;;  %v111_v62 = vld [vmem:[#allocation3] sm:$0x1]  ;;  %p204_p12 = pnand %p203_p11, %p197_p8 }
  0xa4   :  { %v67_v9 = vpop.xlane.xlu1 %66  ;;  %v39_v10 = vpop.xlane.xlu0 %38 }
  0xa5   :  { %160 = vrsqrt.f32 %v67_v9  ;;  %vm70_vm1 = vcmp.eq.f32.partialorder %v67_v9, inf  ;;  %v73_v15 = vand.u32 2147483648, %v67_v9  ;;  %vm72_vm2 = vcmp.eq.f32.partialorder %v67_v9, 0.0 }
  0xa6   :  { %162 = vrsqrt.f32 %v39_v10  ;;  %vm42_vm3 = vcmp.eq.f32.partialorder %v39_v10, inf  ;;  %v45_v18 = vand.u32 2147483648, %v39_v10  ;;  %vm44_vm4 = vcmp.eq.f32.partialorder %v39_v10, 0.0 }
  0xa8   :  { %v53_v11 = vpop.xlane.xlu0 %52 }
  0xa9   :  { %164 = vrsqrt.f32 %v53_v11  ;;  %vm56_vm5 = vcmp.eq.f32.partialorder %v53_v11, inf  ;;  %v59_v26 = vand.u32 2147483648, %v53_v11  ;;  %vm58_vm6 = vcmp.eq.f32.partialorder %v53_v11, 0.0 }
  0xaf   :  { %v161_v12 = vpop.eup %160 }
  0xb0   :  { %v163_v13 = vpop.eup %162  ;;  %v69_v14 = vmul.f32 %v161_v12, %v67_v9 }
  0xb1   :  { %v41_v16 = vmul.f32 %v163_v13, %v39_v10 }
  0xb2   :  { %v71_v17 = vsel %vm70_vm1, %v67_v9, %v69_v14 }
  0xb3   :  { %v165_v19 = vpop.eup %164  ;;  %v74_v20 = vsel %vm72_vm2, %v73_v15, %v71_v17  ;;  %v43_v21 = vsel %vm42_vm3, %v39_v10, %v41_v16 }
  0xb4   :  { %v75_v22 = vadd.f32 1e-12, %v74_v20  ;;  %v46_v23 = vsel %vm44_vm4, %v45_v18, %v43_v21  ;;  %v55_v24 = vmul.f32 %v165_v19, %v53_v11 }
  0xb5   :  { %v47_v25 = vadd.f32 1e-12, %v46_v23 }
  0xb6   :  { %166 = vrcp.f32 %v75_v22  ;;  %v57_v27 = vsel %vm56_vm5, %v53_v11, %v55_v24 }
  0xb7   :  { %168 = vrcp.f32 %v47_v25  ;;  %v60_v28 = vsel %vm58_vm6, %v59_v26, %v57_v27 }
  0xb8   :  { %v61_v29 = vadd.f32 1e-12, %v60_v28 }
  0xba   :  { %170 = vrcp.f32 %v61_v29 }
  0xc0   :  { %v167_v30 = vpop.eup %166 }
  0xc1   :  { %v169_v31 = vpop.eup %168  ;;  %v77_v32 = vmul.f32 %v167_v30, %v34_v0 }
  0xc2   :  { %v49_v33 = vmul.f32 %v169_v31, %v30_v1 }
  0xc4   :  { %v171_v34 = vpop.eup %170  ;;  %v89_v35 = vsub.f32 %v49_v33, %v77_v32 }
  0xc5   :  { %v63_v36 = vmul.f32 %v171_v34, %v32_v2 }
  0xc6   :  { %v90_v37 = vmul.f32 %v89_v35, %v89_v35 }
  0xc7   :  { %v84_v38 = vsub.f32 %v49_v33, %v63_v36 }
  0xc8   :  { %v91_v39 = vsel %vm36_vm0, %v90_v37, 0.0 }
  0xc9   :  { %92 = vadd.xlane.f32.xlu0 %v91_v39  ;;  %v85_v40 = vmul.f32 %v84_v38, %v84_v38 }
  0xcb   :  { %v86_v41 = vsel %vm36_vm0, %v85_v40, 0.0 }
  0xcc   :  { %87 = vadd.xlane.f32.xlu1 %v86_v41 }
 0x156   :  { %v93_v42 = vpop.xlane.xlu0 %92 }
 0x157   :  { %v113_v43 = vsel %vm96_vm7, %v93_v42, 0.0 }
 0x158   :  { %114 = vadd.xlane.f32.xlu0 %v113_v43 }
 0x159   :  { %v88_v44 = vpop.xlane.xlu1 %87 }
 0x15a   :  { %v97_v45 = vsel %vm96_vm7, %v88_v44, 0.0 }
 0x15b   :  { %98 = vadd.xlane.f32.xlu1 %v97_v45 }
 0x1e5   :  { %v115_v47 = vpop.xlane.xlu0 %114 }
 0x1e6   :  { %v116_v48 = vrot.slane %v115_v47, 4 }
 0x1e8   :  { %v117_v49 = vadd.f32 %v116_v48, %v115_v47  ;;  %v99_v50 = vpop.xlane.xlu1 %98 }
 0x1e9   :  { %v100_v51 = vrot.slane %v99_v50, 4 }
 0x1ea   :  { %v118_v52 = vrot.slane %v117_v49, 2 }
 0x1eb   :  { %v101_v53 = vadd.f32 %v100_v51, %v99_v50 }
 0x1ec   :  { %v119_v54 = vadd.f32 %v118_v52, %v117_v49 }
 0x1ed   :  { %v102_v55 = vrot.slane %v101_v53, 2 }
 0x1ee   :  { %v120_v57 = vrot.slane %v119_v54, 1 }
 0x1ef   :  { %v103_v56 = vadd.f32 %v102_v55, %v101_v53 }
 0x1f0   :  { %v121_v60 = vadd.f32 %v120_v57, %v119_v54 }
 0x1f1   :  { %v104_v58 = vrot.slane %v103_v56, 1 }
 0x1f3   :  { %v105_v59 = vadd.f32 %v104_v58, %v103_v56 }
 0x1f5   :  { %151 = vpush %v105_v59 }
 0x1f6   :  { %153 = vpush %v121_v60 }
 0x226   :  { %s152_s0 = spop %151 }
 0x227   :  { %v107_v63 = vstv %s152_s0  ;;  %s154_s20 = spop %153 }
 0x228   :  { %v108_v0 = vadd.f32 %v107_v63, %v94_v61  ;;  %v123_v1 = vstv %s154_s20 }
 0x229   :  { %v124_v2 = vadd.f32 %v123_v1, %v111_v62 }
 0x22a   :  { %110 = vst.msk [vmem:[#allocation2] sm:$0x1] %vm27_vm8, %v108_v0 }
 0x22b   :  { %125 = vst.msk [vmem:[#allocation3] sm:$0x1] %vm27_vm8, %v124_v2 }
 0x231   :  { %v129_v5 = vld [vmem:[#allocation2] sm:$0x1] }
 0x232   :  { %v131_v3 = vld [vmem:[#allocation3] sm:$0x1]  ;;  %v130_v6 = vmul.f32 0.00390625, %v129_v5 }
 0x233   :  { %v132_v4 = vmul.f32 0.00390625, %v131_v3 }
 0x235   :  { %172 = vrcp.f32 %v132_v4 }
 0x23f   :  { %v173_v7 = vpop.eup %172 }
 0x240   :  { %v134_v8 = vmul.f32 %v173_v7, %v130_v6 }
 0x242   :  { %135 = vst.msk [vmem:[#allocation7] sm:$0x1] %vm27_vm8, %v134_v8 }
 0x243   :  { %207 = shalt.err (!%p204_p12)
}
 0x244   :  { %s208_s27 = scalar_lea.hbm %s272_s1, 16 }
 0x245   :  { %p209_p13 = scmp.ne.s32.totalorder %s272_s1, %s208_s27  ;;  %p212_p0 = scmp.lt.u32.totalorder %s208_s27, %s272_s1 }
 0x247   :  { %p214_p1 = pnand %p212_p0, %p209_p13 }
 0x249   :  { %217 = shalt.err (!%p214_p1)
}
 0x24a   :  { %145 = dma.vmem_to_hbm [thread:$0]  %s143_s22, 16, %s272_s1, [#allocation6]  }
 0x24b   :  { %220 = dma.done.wait [#allocation6], 16  }
 0x24c   :  { %221 = vsyncadd [#allocation6], 4294967280 }
 0x24d   :  { %149 = vsyncpa [#allocation5], 1 }
 0x24e   :  { %150 = vsyncpa [#allocation6], 1 }

</bundles_post_ra>
